<compile_context>
chip_gen: v6e
topology: v6e:2x2x1
jax: 0.10.0
libtpu: 0.0.40
codegen_flags: <defaults>
</compile_context>

<pallas_src>
import functools
import math

import numpy as np
import jax
import jax.numpy as jnp
from jax.experimental import pallas as pl
from jax.experimental.pallas import tpu as pltpu


def _round_up(x, m):
    return ((x + m - 1) // m) * m


def _contrastive_batched_kernel(nprop_ref, ngt_ref,           # scalar prefetch (SMEM, int32)
                                scales_ref,                    # (B, 2) f32 in SMEM
                                mapped_ref, prop_ref, gt_ref,  # VMEM blocks
                                out_ref,                       # (1, 8, 128) f32 VMEM
                                *, np_max, ng_max):
    b = pl.program_id(0)
    n_prop = nprop_ref[b]            # valid proposal rows for this image
    n_gt = ngt_ref[b]                # valid gt rows for this image
    sa = scales_ref[b, 0]
    sr = scales_ref[b, 1]

    prop = prop_ref[0]               # (np_max, D) bf16, rows >= n_prop are zero pad
    gt = gt_ref[0]                   # (ng_max, D) bf16, rows >= n_gt  are zero pad
    mapped = mapped_ref[0]           # (np_max, 1) int32 mapped label per proposal

    neg_big = jnp.float32(-1e30)

    # ---- proposal-vs-gt contrastive CE (mean over valid proposals) ----
    logits_p = jax.lax.dot_general(
        prop, gt, (((1,), (1,)), ((), ())),
        preferred_element_type=jnp.float32) * sa               # (np_max, ng_max)
    col_p = jax.lax.broadcasted_iota(jnp.int32, (np_max, ng_max), 1)
    row_p = jax.lax.broadcasted_iota(jnp.int32, (np_max, ng_max), 0)
    logits_p = jnp.where(col_p < n_gt, logits_p, neg_big)       # mask padded gt cols
    m_p = jnp.max(logits_p, axis=-1, keepdims=True)
    lse_p = jnp.log(jnp.sum(jnp.exp(logits_p - m_p), axis=-1, keepdims=True)) + m_p
    logp_p = logits_p - lse_p
    sel = (col_p == mapped) & (row_p < n_prop)                  # one col per valid row
    p_sum = -jnp.sum(jnp.where(sel, logp_p, 0.0))
    # 0/0 -> nan for n_prop == 0 (matches F.cross_entropy on empty input); the
    # nan is dropped by the isnan check in the host wrapper, like the reference.
    p_loss = p_sum / n_prop.astype(jnp.float32)

    # ---- gt-vs-gt contrastive CE, targets = arange(n_gt) ----
    logits_g = jax.lax.dot_general(
        gt, gt, (((1,), (1,)), ((), ())),
        preferred_element_type=jnp.float32) * sr                # (ng_max, ng_max)
    col_g = jax.lax.broadcasted_iota(jnp.int32, (ng_max, ng_max), 1)
    row_g = jax.lax.broadcasted_iota(jnp.int32, (ng_max, ng_max), 0)
    logits_g = jnp.where(col_g < n_gt, logits_g, neg_big)
    m_g = jnp.max(logits_g, axis=-1, keepdims=True)
    lse_g = jnp.log(jnp.sum(jnp.exp(logits_g - m_g), axis=-1, keepdims=True)) + m_g
    # diagonal extract (no full eye * logp multiply)
    diag = jnp.sum(jnp.where(row_g == col_g, logits_g, 0.0), axis=-1, keepdims=True)
    diag_logp = diag - lse_g                                    # (ng_max, 1)
    row_valid_g = jax.lax.broadcasted_iota(jnp.int32, (ng_max, 1), 0) < n_gt
    g_sum = -jnp.sum(jnp.where(row_valid_g, diag_logp, 0.0))
    g_loss = g_sum / n_gt.astype(jnp.float32)

    # ---- lane-aligned output slab: sublane 0 / lane 0 = p_loss, lane 1 = g_loss ----
    lane = jax.lax.broadcasted_iota(jnp.int32, (8, 128), 1)
    sub = jax.lax.broadcasted_iota(jnp.int32, (8, 128), 0)
    slab = jnp.where((sub == 0) & (lane == 0), p_loss,
                     jnp.where((sub == 0) & (lane == 1), g_loss, 0.0))
    out_ref[0] = slab


@functools.lru_cache(maxsize=None)
def _build_contrastive_batched(batch, np_max, ng_max, d):
    """Build (and cache) the batched pallas_call + reduction for given padded shapes."""
    kernel = functools.partial(_contrastive_batched_kernel,
                               np_max=np_max, ng_max=ng_max)
    grid_spec = pltpu.PrefetchScalarGridSpec(
        num_scalar_prefetch=2,                                  # n_prop, n_gt
        grid=(batch,),
        in_specs=[
            pl.BlockSpec(memory_space=pltpu.MemorySpace.SMEM),            # scales (B,2) f32
            pl.BlockSpec((1, np_max, 1), lambda b, *_: (b, 0, 0)),        # mapped labels
            pl.BlockSpec((1, np_max, d), lambda b, *_: (b, 0, 0)),        # proposals bf16
            pl.BlockSpec((1, ng_max, d), lambda b, *_: (b, 0, 0)),        # gt bf16
        ],
        out_specs=pl.BlockSpec((1, 8, 128), lambda b, *_: (b, 0, 0)),
    )
    call = pl.pallas_call(
        kernel,
        out_shape=jax.ShapeDtypeStruct((batch, 8, 128), jnp.float32),
        grid_spec=grid_spec,
        compiler_params=pltpu.CompilerParams(
            dimension_semantics=("parallel",)),
    )

    @jax.jit
    def run(n_prop, n_gt, scales, mapped, prop, gt):
        per_img = call(n_prop, n_gt, scales, mapped, prop, gt)
        p_mean = jnp.mean(per_img[:, 0, 0])
        g_mean = jnp.mean(per_img[:, 0, 1])
        return p_mean, g_mean, jnp.isnan(p_mean), jnp.isnan(g_mean)

    return run


class ContrastivePersonSearchLoss:
    """JAX/Pallas re-implementation of the PyTorch module's forward pass.

    grad_scale (GradScale) is identity in the forward pass; loss_override /
    logit_bn are empty with the default (loss_cfg=None) construction, so plain
    cross-entropy is used.
    """

    def __init__(self, lambda_=1.0, scale_a=2.5, scale_r=2.5,
                 scale_ax=5, scale_rx=5, loss_policy=3, dbg=False):
        self.lambda_ = lambda_          # only affects backward; forward is identity
        self.scale_a = scale_a
        self.scale_r = scale_r
        self.scale_ax = scale_ax
        self.scale_rx = scale_rx
        self.loss_policy = loss_policy
        self.dbg = dbg

    def _calc(self, num_cls):
        return 1.414 * math.log(num_cls)

    def forward(self, embeddings, label, flags_, fgbg_label, rois):
        emb_np = np.asarray(embeddings, dtype=np.float32)
        label_np = np.asarray(label)
        fgbg_flag = np.asarray(fgbg_label) == 0
        # int32 (not uint8) so batches with >255 images don't silently wrap.
        source = np.asarray(rois)[:, 0].astype(np.int32)
        gt_flag = np.asarray(flags_) == 1
        batch = int(source.max()) + 1

        losses = {}
        if not (self.loss_policy & 3):
            # TODO(synk): loss_policy & 12 branch (batch_prop_cont_loss, cross-image /
            # distributed gather path) is unused at the default loss_policy=3 and is
            # not implemented here.
            return losses

        props, gts, mappeds, n_props, n_gts, scales = [], [], [], [], [], []
        for i in range(batch):
            m = source == i
            e, l, g, f = emb_np[m], label_np[m], gt_flag[m], fgbg_flag[m]
            e_fg, l_fg, g_fg = e[f], l[f], g[f]
            gt_emb, prop_emb = e_fg[g_fg], e_fg[~g_fg]
            label_gt, label_prop = l_fg[g_fg], l_fg[~g_fg]
            # label_mapper (host-side dict, as in the PyTorch reference)
            mapper = {int(o): j for j, o in enumerate(label_gt.tolist())}
            mapped = np.array([mapper[int(x)] for x in label_prop.tolist()],
                              dtype=np.int32)
            n_g, n_p = gt_emb.shape[0], prop_emb.shape[0]
            sa = (self.scale_a if self.scale_a > 0
                  else self.scale_a * self._calc(max(n_g, 1)) * -1)
            sr = (self.scale_r if self.scale_r > 0
                  else self.scale_r * self._calc(max(n_g, 1)) * -1)
            props.append(prop_emb)
            gts.append(gt_emb)
            mappeds.append(mapped)
            n_props.append(n_p)
            n_gts.append(n_g)
            scales.append((sa, sr))

        d = emb_np.shape[1]
        # Pad proposal rows to a multiple of 16 (bf16 sublane packing) and the
        # gt/logit axis to a multiple of 128 (lane-dense softmax). Bucketing the
        # padded sizes also keeps recompiles rare.
        np_max = max(16, _round_up(max(n_props), 16))
        ng_max = max(128, _round_up(max(n_gts), 128))

        prop_stack = np.zeros((batch, np_max, d), np.float32)
        gt_stack = np.zeros((batch, ng_max, d), np.float32)
        mapped_stack = np.zeros((batch, np_max, 1), np.int32)
        for i in range(batch):
            prop_stack[i, :n_props[i]] = props[i]
            gt_stack[i, :n_gts[i]] = gts[i]
            mapped_stack[i, :n_props[i], 0] = mappeds[i]

        run = _build_contrastive_batched(batch, np_max, ng_max, d)
        p_mean, g_mean, p_nan, g_nan = run(
            jnp.asarray(np.asarray(n_props, np.int32)),
            jnp.asarray(np.asarray(n_gts, np.int32)),
            jnp.asarray(np.asarray(scales, np.float32).reshape(batch, 2)),
            jnp.asarray(mapped_stack),
            jnp.asarray(prop_stack, jnp.bfloat16),
            jnp.asarray(gt_stack, jnp.bfloat16))

        # Single host sync for both nan checks (the reference drops nan losses);
        # the loss values themselves stay on device.
        p_nan, g_nan = jax.device_get((p_nan, g_nan))
        if (self.loss_policy & 1) and not bool(p_nan):
            losses['p_contrastive_loss'] = p_mean
        if (self.loss_policy & 2) and not bool(g_nan):
            losses['gt_contrastive_loss'] = g_mean

        # TODO(synk): loss_policy & 12 branch (batch_prop_cont_loss, cross-image /
        # distributed gather path) is unused at the default loss_policy=3 and is
        # not implemented here.
        return losses


# ---------------- reference (pure numpy) for correctness check ----------------
def _ref_ce(logits, targets):
    m = logits.max(-1, keepdims=True)
    lse = np.log(np.exp(logits - m).sum(-1, keepdims=True)) + m
    logp = logits - lse
    return -np.mean(logp[np.arange(logits.shape[0]), targets])


def _reference_forward(embeddings, label, flags_, fgbg_label, rois,
                       scale_a=2.5, scale_r=2.5):
    emb = np.asarray(embeddings)
    label = np.asarray(label)
    fgbg_flag = np.asarray(fgbg_label) == 0
    source = np.asarray(rois)[:, 0].astype(np.int32)
    gt_flag = np.asarray(flags_) == 1
    p_losses, g_losses = [], []
    for i in range(int(source.max()) + 1):
        m = source == i
        e, l, g, f = emb[m], label[m], gt_flag[m], fgbg_flag[m]
        e, l, g = e[f], l[f], g[f]
        G, P = e[g], e[~g]
        lg, lp = l[g], l[~g]
        mapper = {int(o): j for j, o in enumerate(lg.tolist())}
        mapped = np.array([mapper[int(x)] for x in lp.tolist()])
        p_losses.append(_ref_ce(P @ G.T * scale_a, mapped))
        g_losses.append(_ref_ce(G @ G.T * scale_r, np.arange(G.shape[0])))
    return (sum(p_losses) / len(p_losses), sum(g_losses) / len(g_losses))


if __name__ == "__main__":
    key = jax.random.PRNGKey(0)
    k_emb, k_lbl, k_box = jax.random.split(key, 3)

    N_img, N_gt, N_prop, D = 2, 4, 12, 32
    N = N_img * (N_gt + N_prop)

    emb = jax.random.normal(k_emb, (N, D), jnp.float32)
    emb = emb / jnp.linalg.norm(emb, axis=1, keepdims=True)

    prop_label_idx = np.asarray(jax.random.randint(k_lbl, (N_img, N_prop), 0, N_gt))
    labels, flags, fgbg, src = [], [], [], []
    for i in range(N_img):
        gt_lbls = np.arange(N_gt) + 10 * i
        p_lbls = gt_lbls[prop_label_idx[i]].copy()
        lbl = np.concatenate([gt_lbls, p_lbls]).astype(np.int64)
        fg = np.zeros(N_gt + N_prop, np.int64)
        fg[-2:] = 1            # last two proposals of each image are background
        lbl[-2:] = -1          # background labels (excluded by fgbg mask)
        labels.append(lbl)
        flags.append(np.array([1] * N_gt + [0] * N_prop, np.int64))
        fgbg.append(fg)
        src.append(np.full(N_gt + N_prop, i, np.float32))

    label = jnp.asarray(np.concatenate(labels), jnp.int32)
    flags_ = jnp.asarray(np.concatenate(flags), jnp.int32)
    fgbg_label = jnp.asarray(np.concatenate(fgbg), jnp.int32)
    boxes = np.asarray(jax.random.uniform(k_box, (N, 4), jnp.float32)) * 100.0
    rois = jnp.asarray(np.concatenate([np.concatenate(src)[:, None], boxes], axis=1),
                       jnp.float32)

    module = ContrastivePersonSearchLoss(lambda_=0.1)
    losses = module.forward(emb, label, flags_, fgbg_label, rois)
    losses = {k: jax.block_until_ready(v) for k, v in losses.items()}

    # Reference uses bf16-rounded embeddings so the only remaining difference is
    # the f32 accumulation order inside the MXU matmuls.
    emb_q = np.asarray(jnp.asarray(emb, jnp.bfloat16).astype(jnp.float32))
    ref_p, ref_g = _reference_forward(emb_q, label, flags_, fgbg_label, rois)
    assert np.allclose(float(losses['p_contrastive_loss']), ref_p, rtol=2e-3, atol=2e-3)
    assert np.allclose(float(losses['gt_contrastive_loss']), ref_g, rtol=2e-3, atol=2e-3)

    print("KERNEL_OK")
</pallas_src>

<mosaic_0001>
module attributes {stable_mosaic.version = 11 : i64} {
  func.func @_contrastive_batched_kernel(%arg0: i32, %arg1: memref<2xi32, #tpu.memory_space<smem>>, %arg2: memref<2xi32, #tpu.memory_space<smem>>, %arg3: memref<2x2xf32, #tpu.memory_space<smem>>, %arg4: memref<1x16x1xi32, #tpu.memory_space<vmem>>, %arg5: memref<1x16x32xbf16, #tpu.memory_space<vmem>>, %arg6: memref<1x128x32xbf16, #tpu.memory_space<vmem>>, %arg7: memref<1x8x128xf32, #tpu.memory_space<vmem>>) attributes {dimension_semantics = [#tpu.dimension_semantics<parallel>], iteration_bounds = array<i64: 2>, scalar_prefetch = 2 : i64, scratch_operands = 0 : i64, tpu.core_type = #tpu.core_type<tc>, window_params = [{transform_indices = @transform_0, window_bounds = array<i64: 2, 2>}, {transform_indices = @transform_1, window_bounds = array<i64: 1, 16, 1>}, {transform_indices = @transform_2, window_bounds = array<i64: 1, 16, 32>}, {transform_indices = @transform_3, window_bounds = array<i64: 1, 128, 32>}, {transform_indices = @transform_4, window_bounds = array<i64: 1, 8, 128>}]} {
    %0 = arith.index_cast %arg0 : i32 to index
    %1 = memref.load %arg1[%0] : memref<2xi32, #tpu.memory_space<smem>>
    %2 = arith.index_cast %arg0 : i32 to index
    %3 = memref.load %arg2[%2] : memref<2xi32, #tpu.memory_space<smem>>
    %4 = arith.index_cast %arg0 : i32 to index
    %c0 = arith.constant 0 : index
    %5 = memref.load %arg3[%4, %c0] : memref<2x2xf32, #tpu.memory_space<smem>>
    %6 = arith.index_cast %arg0 : i32 to index
    %c1 = arith.constant 1 : index
    %7 = memref.load %arg3[%6, %c1] : memref<2x2xf32, #tpu.memory_space<smem>>
    %c0_0 = arith.constant 0 : index
    %c0_1 = arith.constant 0 : index
    %c0_2 = arith.constant 0 : index
    %8 = vector.load %arg5[%c0_0, %c0_1, %c0_2] : memref<1x16x32xbf16, #tpu.memory_space<vmem>>, vector<1x16x32xbf16>
    %9 = vector.shape_cast %8 : vector<1x16x32xbf16> to vector<16x32xbf16>
    %c0_3 = arith.constant 0 : index
    %c0_4 = arith.constant 0 : index
    %c0_5 = arith.constant 0 : index
    %10 = vector.load %arg6[%c0_3, %c0_4, %c0_5] : memref<1x128x32xbf16, #tpu.memory_space<vmem>>, vector<1x128x32xbf16>
    %11 = vector.shape_cast %10 : vector<1x128x32xbf16> to vector<128x32xbf16>
    %c0_6 = arith.constant 0 : index
    %c0_7 = arith.constant 0 : index
    %c0_8 = arith.constant 0 : index
    %12 = vector.load %arg4[%c0_6, %c0_7, %c0_8] : memref<1x16x1xi32, #tpu.memory_space<vmem>>, vector<1x16x1xi32>
    %13 = vector.shape_cast %12 : vector<1x16x1xi32> to vector<16x1xi32>
    %cst = arith.constant dense<0.000000e+00> : vector<16x128xf32>
    %14 = tpu.matmul %9, %11, %cst {dimension_numbers = #tpu.dot_dimension_numbers<[1], [1], [0], [0], [0, 0, 1, 0], [], []>} : vector<16x32xbf16>, vector<128x32xbf16>, vector<16x128xf32> -> vector<16x128xf32>
    %15 = vector.broadcast %5 : f32 to vector<16x128xf32>
    %16 = arith.mulf %14, %15 : vector<16x128xf32>
    %17 = tpu.iota {dimensions = array<i32: 1>} : vector<16x128xi32>
    %18 = tpu.iota {dimensions = array<i32: 0>} : vector<16x128xi32>
    %19 = vector.broadcast %3 : i32 to vector<16x128xi32>
    %20 = arith.cmpi slt, %17, %19 : vector<16x128xi32>
    %cst_9 = arith.constant -1.000000e+30 : f32
    %21 = vector.broadcast %cst_9 : f32 to vector<16x128xf32>
    %22 = arith.select %20, %16, %21 : vector<16x128xi1>, vector<16x128xf32>
    %cst_10 = arith.constant dense<0xFF800000> : vector<16xf32>
    %23 = vector.multi_reduction <maximumf>, %22, %cst_10 [1] : vector<16x128xf32> to vector<16xf32>
    %24 = vector.shape_cast %23 : vector<16xf32> to vector<16x1xf32>
    %25 = vector.broadcast %24 : vector<16x1xf32> to vector<16x128xf32>
    %26 = arith.subf %22, %25 : vector<16x128xf32>
    %27 = math.exp %26 : vector<16x128xf32>
    %cst_11 = arith.constant dense<0.000000e+00> : vector<16xf32>
    %28 = vector.multi_reduction <add>, %27, %cst_11 [1] : vector<16x128xf32> to vector<16xf32>
    %29 = vector.shape_cast %28 : vector<16xf32> to vector<16x1xf32>
    %30 = math.log %29 : vector<16x1xf32>
    %31 = arith.addf %30, %24 : vector<16x1xf32>
    %32 = vector.broadcast %31 : vector<16x1xf32> to vector<16x128xf32>
    %33 = arith.subf %22, %32 : vector<16x128xf32>
    %34 = vector.broadcast %13 : vector<16x1xi32> to vector<16x128xi32>
    %35 = arith.cmpi eq, %17, %34 : vector<16x128xi32>
    %36 = vector.broadcast %1 : i32 to vector<16x128xi32>
    %37 = arith.cmpi slt, %18, %36 : vector<16x128xi32>
    %38 = arith.andi %35, %37 : vector<16x128xi1>
    %cst_12 = arith.constant 0.000000e+00 : f32
    %39 = vector.broadcast %cst_12 : f32 to vector<16x128xf32>
    %40 = arith.select %38, %33, %39 : vector<16x128xi1>, vector<16x128xf32>
    %41 = vector.shape_cast %40 : vector<16x128xf32> to vector<1x16x128xf32>
    %cst_13 = arith.constant dense<0.000000e+00> : vector<1xf32>
    %42 = vector.multi_reduction <add>, %41, %cst_13 [1, 2] : vector<1x16x128xf32> to vector<1xf32>
    %43 = vector.shape_cast %42 : vector<1xf32> to vector<1x1x1xf32>
    %44 = vector.extract %43[0, 0, 0] : f32 from vector<1x1x1xf32>
    %cst_14 = arith.constant 0.000000e+00 : f32
    %45 = arith.subf %cst_14, %44 : f32
    %46 = arith.sitofp %1 : i32 to f32
    %47 = arith.divf %45, %46 : f32
    %cst_15 = arith.constant dense<0.000000e+00> : vector<128x128xf32>
    %48 = tpu.matmul %11, %11, %cst_15 {dimension_numbers = #tpu.dot_dimension_numbers<[1], [1], [0], [0], [0, 0, 1, 0], [], []>} : vector<128x32xbf16>, vector<128x32xbf16>, vector<128x128xf32> -> vector<128x128xf32>
    %49 = vector.broadcast %7 : f32 to vector<128x128xf32>
    %50 = arith.mulf %48, %49 : vector<128x128xf32>
    %51 = tpu.iota {dimensions = array<i32: 1>} : vector<128x128xi32>
    %52 = tpu.iota {dimensions = array<i32: 0>} : vector<128x128xi32>
    %53 = vector.broadcast %3 : i32 to vector<128x128xi32>
    %54 = arith.cmpi slt, %51, %53 : vector<128x128xi32>
    %cst_16 = arith.constant -1.000000e+30 : f32
    %55 = vector.broadcast %cst_16 : f32 to vector<128x128xf32>
    %56 = arith.select %54, %50, %55 : vector<128x128xi1>, vector<128x128xf32>
    %cst_17 = arith.constant dense<0xFF800000> : vector<128xf32>
    %57 = vector.multi_reduction <maximumf>, %56, %cst_17 [1] : vector<128x128xf32> to vector<128xf32>
    %58 = vector.shape_cast %57 : vector<128xf32> to vector<128x1xf32>
    %59 = vector.broadcast %58 : vector<128x1xf32> to vector<128x128xf32>
    %60 = arith.subf %56, %59 : vector<128x128xf32>
    %61 = math.exp %60 : vector<128x128xf32>
    %cst_18 = arith.constant dense<0.000000e+00> : vector<128xf32>
    %62 = vector.multi_reduction <add>, %61, %cst_18 [1] : vector<128x128xf32> to vector<128xf32>
    %63 = vector.shape_cast %62 : vector<128xf32> to vector<128x1xf32>
    %64 = math.log %63 : vector<128x1xf32>
    %65 = arith.addf %64, %58 : vector<128x1xf32>
    %66 = arith.cmpi eq, %52, %51 : vector<128x128xi32>
    %cst_19 = arith.constant 0.000000e+00 : f32
    %67 = vector.broadcast %cst_19 : f32 to vector<128x128xf32>
    %68 = arith.select %66, %56, %67 : vector<128x128xi1>, vector<128x128xf32>
    %cst_20 = arith.constant dense<0.000000e+00> : vector<128xf32>
    %69 = vector.multi_reduction <add>, %68, %cst_20 [1] : vector<128x128xf32> to vector<128xf32>
    %70 = vector.shape_cast %69 : vector<128xf32> to vector<128x1xf32>
    %71 = arith.subf %70, %65 : vector<128x1xf32>
    %72 = tpu.iota {dimensions = array<i32: 0>} : vector<128x1xi32>
    %73 = vector.broadcast %3 : i32 to vector<128x1xi32>
    %74 = arith.cmpi slt, %72, %73 : vector<128x1xi32>
    %cst_21 = arith.constant 0.000000e+00 : f32
    %75 = vector.broadcast %cst_21 : f32 to vector<128x1xf32>
    %76 = arith.select %74, %71, %75 : vector<128x1xi1>, vector<128x1xf32>
    %77 = vector.shape_cast %76 : vector<128x1xf32> to vector<1x128x1xf32>
    %cst_22 = arith.constant dense<0.000000e+00> : vector<1xf32>
    %78 = vector.multi_reduction <add>, %77, %cst_22 [1, 2] : vector<1x128x1xf32> to vector<1xf32>
    %79 = vector.shape_cast %78 : vector<1xf32> to vector<1x1x1xf32>
    %80 = vector.extract %79[0, 0, 0] : f32 from vector<1x1x1xf32>
    %cst_23 = arith.constant 0.000000e+00 : f32
    %81 = arith.subf %cst_23, %80 : f32
    %82 = arith.sitofp %3 : i32 to f32
    %83 = arith.divf %81, %82 : f32
    %84 = tpu.iota {dimensions = array<i32: 1>} : vector<8x128xi32>
    %85 = tpu.iota {dimensions = array<i32: 0>} : vector<8x128xi32>
    %c0_i32 = arith.constant 0 : i32
    %86 = vector.broadcast %c0_i32 : i32 to vector<8x128xi32>
    %87 = arith.cmpi eq, %85, %86 : vector<8x128xi32>
    %c0_i32_24 = arith.constant 0 : i32
    %88 = vector.broadcast %c0_i32_24 : i32 to vector<8x128xi32>
    %89 = arith.cmpi eq, %84, %88 : vector<8x128xi32>
    %90 = arith.andi %87, %89 : vector<8x128xi1>
    %c0_i32_25 = arith.constant 0 : i32
    %91 = vector.broadcast %c0_i32_25 : i32 to vector<8x128xi32>
    %92 = arith.cmpi eq, %85, %91 : vector<8x128xi32>
    %c1_i32 = arith.constant 1 : i32
    %93 = vector.broadcast %c1_i32 : i32 to vector<8x128xi32>
    %94 = arith.cmpi eq, %84, %93 : vector<8x128xi32>
    %95 = arith.andi %92, %94 : vector<8x128xi1>
    %cst_26 = arith.constant 0.000000e+00 : f32
    %96 = vector.broadcast %83 : f32 to vector<8x128xf32>
    %97 = vector.broadcast %cst_26 : f32 to vector<8x128xf32>
    %98 = arith.select %95, %96, %97 : vector<8x128xi1>, vector<8x128xf32>
    %99 = vector.broadcast %47 : f32 to vector<8x128xf32>
    %100 = arith.select %90, %99, %98 : vector<8x128xi1>, vector<8x128xf32>
    %c0_27 = arith.constant 0 : index
    %c0_28 = arith.constant 0 : index
    %c0_29 = arith.constant 0 : index
    %101 = vector.load %arg7[%c0_27, %c0_28, %c0_29] : memref<1x8x128xf32, #tpu.memory_space<vmem>>, vector<1x8x128xf32>
    %102 = vector.shape_cast %101 : vector<1x8x128xf32> to vector<8x128xf32>
    %103 = vector.shape_cast %100 : vector<8x128xf32> to vector<1x8x128xf32>
    tpu.vector_store %arg7[%c0_27, %c0_28, %c0_29], %103 {strides = array<i32>} : memref<1x8x128xf32, #tpu.memory_space<vmem>>, vector<1x8x128xf32>,
    return
  }
  func.func @transform_0(%arg0: i32, %arg1: memref<2xi32, #tpu.memory_space<smem>>, %arg2: memref<2xi32, #tpu.memory_space<smem>>) -> (i32, i32) {
    %c0_i32 = arith.constant 0 : i32
    %c0_i32_0 = arith.constant 0 : i32
    %c0_i32_1 = arith.constant 0 : i32
    return %c0_i32, %c0_i32_0 : i32, i32
  }
  func.func @transform_1(%arg0: i32, %arg1: memref<2xi32, #tpu.memory_space<smem>>, %arg2: memref<2xi32, #tpu.memory_space<smem>>) -> (i32, i32, i32) {
    %c0_i32 = arith.constant 0 : i32
    %c0_i32_0 = arith.constant 0 : i32
    %c0_i32_1 = arith.constant 0 : i32
    return %arg0, %c0_i32, %c0_i32_0 : i32, i32, i32
  }
  func.func @transform_2(%arg0: i32, %arg1: memref<2xi32, #tpu.memory_space<smem>>, %arg2: memref<2xi32, #tpu.memory_space<smem>>) -> (i32, i32, i32) {
    %c0_i32 = arith.constant 0 : i32
    %c0_i32_0 = arith.constant 0 : i32
    %c0_i32_1 = arith.constant 0 : i32
    return %arg0, %c0_i32, %c0_i32_0 : i32, i32, i32
  }
  func.func @transform_3(%arg0: i32, %arg1: memref<2xi32, #tpu.memory_space<smem>>, %arg2: memref<2xi32, #tpu.memory_space<smem>>) -> (i32, i32, i32) {
    %c0_i32 = arith.constant 0 : i32
    %c0_i32_0 = arith.constant 0 : i32
    %c0_i32_1 = arith.constant 0 : i32
    return %arg0, %c0_i32, %c0_i32_0 : i32, i32, i32
  }
  func.func @transform_4(%arg0: i32, %arg1: memref<2xi32, #tpu.memory_space<smem>>, %arg2: memref<2xi32, #tpu.memory_space<smem>>) -> (i32, i32, i32) {
    %c0_i32 = arith.constant 0 : i32
    %c0_i32_0 = arith.constant 0 : i32
    %c0_i32_1 = arith.constant 0 : i32
    return %arg0, %c0_i32, %c0_i32_0 : i32, i32, i32
  }
}

</mosaic_0001>

<bundles_post_ra>
// kernel: run.1
= control target key start
LH: loop header
LB: loop body
LE: loop exit
PB: predicated region body
PF: predicated region fallthrough
CT: control target
= control target key end

     0   :  { %s1907_s0 = inlined_call_operand.vmem [shape: s32[2], index: 0, kind: input, shape index: {}]   ;;  %s1908_s2 = inlined_call_operand.vmem [shape: f32[2,2], index: 2, kind: input, shape index: {}]   ;;  %s1909_s3 = inlined_call_operand.vmem [shape: s32[2,16,1], index: 3, kind: input, shape index: {}]   ;;  %s1910_s4 = inlined_call_operand.vmem [shape: bf16[2,16,32], index: 4, kind: input, shape index: {}]   ;;  %s1911_s5 = inlined_call_operand.vmem [shape: bf16[2,128,32], index: 5, kind: input, shape index: {}]   ;;  %s1912_s6 = inlined_call_operand.vmem [shape: f32[2,8,128], index: 6, kind: output, shape index: {}]   ;;  %s1913_s1 = inlined_call_operand.vmem [shape: s32[2], index: 1, kind: input, shape index: {}]  }
   0x1   :  { %s11_s23 = sshll.u32 %s1907_s0, 4  ;;  %s15_s26 = sshll.u32 %s1913_s1, 4  ;;  %s12_s23 = int_to_ptr.vmem [resolvable:$true] %s11_s23  ;;  %s16_s26 = int_to_ptr.vmem [resolvable:$true] %s15_s26 }
   0x2   :  { %s1272_s27 = scalar_lea.vmem %s12_s23, 16  ;;  %p1277_p1 = scmp.lt.s32.totalorder %s12_s23, %s12_s23 }
   0x3   :  { %p1273_p0 = scmp.ne.s32.totalorder %s12_s23, %s1272_s27  ;;  %p1278_p2 = scmp.lt.s32.totalorder %s1272_s27, %s1272_s27 }
   0x5   :  { %p1279_p3 = por %p1278_p2, %p1277_p1 }
   0x7   :  { %p1280_p4 = pnand %p1279_p3, %p1273_p0 }
   0x9   :  { %1283 = shalt.err (!%p1280_p4)  }
   0xa   :  { %s1325_s28 = smov [#allocation3]   ;;  %s1284_s29 = scalar_lea.vmem %s16_s26, 16 }
   0xb   :  { %14 = dma.vmem_to_smem %s12_s23, 16, %s1325_s28, [#allocation2] }
   0xc   :  { %p1285_p5 = scmp.ne.s32.totalorder %s16_s26, %s1284_s29  ;;  %p1289_p6 = scmp.lt.s32.totalorder %s16_s26, %s16_s26 }
   0xd   :  { %p1290_p7 = scmp.lt.s32.totalorder %s1284_s29, %s1284_s29 }
   0xf   :  { %p1291_p8 = por %p1290_p7, %p1289_p6 }
  0x11   :  { %p1292_p9 = pnand %p1291_p8, %p1285_p5 }
  0x13   :  { %1295 = shalt.err (!%p1292_p9)  }
  0x14   :  { %s1326_s0 = smov [#allocation4]  }
  0x15   :  { %18 = dma.vmem_to_smem %s16_s26, 16, %s1326_s0, [#allocation2] }
  0x16   :  { %1315 = dma.done.wait [#allocation2], 32 }
  0x17   :  { %1316 = vsyncadd [#allocation2], 4294967264 }
  0x18   :  { %20 = sfence }
  0x19   :  { %21 = vsyncpa [#allocation6], 0  ;;  %s1372_s1 = smov 0  }
  0x1a LB: > { %s1378_s30 = sadd.s32 4294967295, %s1323_s1   ;;  %p1032_p10 = scmp.ge.s32.totalorder %s1323_s1, 1  ;;  %s1323_s1 = sphi %s1372_s1, %s27_s1  }
  0x1b   : > { %p157_p11 = scmp.lt.s32.totalorder %s1323_s1, 3  ;;  %s170_s9 = sshll.u32 %s1908_s2, 4  ;;  %s171_s9 = int_to_ptr.vmem [resolvable:$true] %s170_s9 }
  0x1c   : > { %p1169_p13 = scmp.eq.s32.totalorder %s1378_s30, 0  ;;  %s1296_s11 = scalar_lea.vmem %s171_s9, 32 }
  0x1d   : > { %p1385_p12 = pnand %p1032_p10, %p157_p11  ;;  %p1297_p2 = scmp.ne.s32.totalorder %s171_s9, %s1296_s11 }
  0x1e   : > { %p1304_p6 = scmp.lt.s32.totalorder %s171_s9, %s171_s9  ;;  %p1305_p7 = scmp.lt.s32.totalorder %s1296_s11, %s1296_s11 }
  0x1f   : > { %p1165_p0 = pneg %p1385_p12 }
  0x20   : > { %p1306_p8 = por %p1305_p7, %p1304_p6 }
  0x21   : > { %p1166_p1 = pnand %p1169_p13, %p1165_p0 }
  0x23   : > { %p1298_p3 = pneg %p1166_p1 }
  0x25   : > { %p1299_p4 = pnand %p1298_p3, %p1297_p2 }
  0x27   : > { %p1300_p5 = pneg %p1299_p4 }
  0x29   : > { %p1307_p9 = pnand %p1306_p8, %p1300_p5 }
  0x2b   : > { %1310 = shalt.err (!%p1307_p9)
}
  0x2c   : > { %s1327_s12 = smov [#allocation5]   ;;  %207 = sbr.rel (%p1385_p12) target bundleno = 936 (0x3a8), region = 36 }
  0x2d   : > { %1168 = dma.vmem_to_smem (!%p1166_p1), %s171_s9, 32, %s1327_s12, [#allocation6]  }
  0x31   : > { %1318 = dma.done.wait (%p1169_p13), [#allocation6], 32  }
  0x32   : > { %1320 = vsyncadd (%p1169_p13), [#allocation6], 4294967264 }
  0x33   : > { %213 = sfence }
  0x34   : > { %p243_p10 = scmp.lt.s32.totalorder %s1378_s30, 1  ;;  %v1328_v0 = vmov 0.0   ;;  %vm1329_vm0 = vmmov 0   ;;  %vm334_vm1 = vcmask 261120   ;;  %s1044_s22 = sshll.u32 %s1378_s30, 7  ;;  %v406_v18 = vlaneseq }
  0x35   : > { %1093 = vmatprep.subr.bf16.mxu0 %v1328_v0  ;;  %1109 = vmatprep.mubr.msk.bf16.mxu0 %vm1329_vm0, %v1328_v0  ;;  %s267_s23 = sadd.s32 1, %s1044_s22  ;;  %s1456_s24 = sld [smem:[#allocation4 + %s1378_s30]] }
  0x36   : > { %s1402_s13 = scalar_select %p243_p10, %s1378_s30, 1  ;;  %v1459_v19 = vand.u32 127, %v406_v18 }
  0x37   : > { %s268_s25 = sld [smem:[#allocation5 + %s267_s23]] }
  0x38   : > { %s1067_s14 = sshll.u32 %s1402_s13, 6  ;;  %s1066_s18 = sshll.u32 %s1402_s13, 3 }
  0x39   : > { %s1408_s17 = scalar_lea.vmem %s1911_s5, %s1067_s14  ;;  %s1422_s21 = scalar_lea.vmem %s1910_s4, %s1066_s18 }
  0x3a   : > { %v1187_v1 = vld [vmem:[%s1408_s17 + $0x38] sm:$0xff]   ;;  %v1188_v2 = vld [vmem:[%s1408_s17 + $0x30] sm:$0xff]   ;;  %v1194_v4 = vld [vmem:[%s1408_s17] sm:$0xff]   ;;  %s1520_s26 = sld [smem:[#allocation5 + %s1044_s22]]  ;;  %s1065_s27 = sshll.u32 %s1402_s13, 4 }
  0x3b   : > { %1145 = vmatprep.subr.msk.bf16.mxu1 %vm334_vm1, %v1187_v1  ;;  %v360_v3 = vsel %vm334_vm1, %v1187_v1, 0  ;;  %v357_v5 = vsel %vm334_vm1, %v1188_v2, 0  ;;  %v1189_v6 = vld [vmem:[%s1408_s17 + $0x28] sm:$0xff]   ;;  %1129 = vmatprep.mubr.msk.bf16.mxu1 %vm334_vm1, %v1194_v4  ;;  %v1190_v8 = vld [vmem:[%s1408_s17 + $0x20] sm:$0xff]   ;;  %v1191_v10 = vld [vmem:[%s1408_s17 + $0x18] sm:$0xff]   ;;  %v339_v16 = vsel %vm334_vm1, %v1194_v4, 0  ;;  %v1462_v20 = vstv %s1456_s24  ;;  %s247_s0 = scalar_lea.vmem %s1909_s3, %s1065_s27  ;;  %s926_s8 = scvt.s32.f32 %s1456_s24 }
  0x3c   : > { %1114 = vmatpush3.bf16.xpose.msra.mxu1 %v360_v3  ;;  %1094 = vmatpush3.bf16.xpose.msra.mxu0 %v360_v3  ;;  %v354_v7 = vsel %vm334_vm1, %v1189_v6, 0  ;;  %v351_v9 = vsel %vm334_vm1, %v1190_v8, 0  ;;  %v348_v11 = vsel %vm334_vm1, %v1191_v10, 0  ;;  %v1192_v12 = vld [vmem:[%s1408_s17 + $0x10] sm:$0xff]   ;;  %v1193_v14 = vld [vmem:[%s1408_s17 + $0x8] sm:$0xff]   ;;  %v1195_v17 = vld [vmem:[%s1422_s21] sm:$0xff]   ;;  %vm1468_vm2 = vcmp.lt.s32.totalorder %v1459_v19, %v1462_v20  ;;  %s261_s21 = scalar_lea.vmem %s1912_s6, %s1066_s18 }
  0x3d   : > { %1146 = vmatprep.subr.msk.bf16.mxu1 %vm334_vm1, %v1188_v2  ;;  %1095 = vmatprep.subr.bf16.mxu0 %v1328_v0  ;;  %v345_v13 = vsel %vm334_vm1, %v1192_v12, 0  ;;  %v342_v15 = vsel %vm334_vm1, %v1193_v14, 0  ;;  %v1464_v21 = vstv %s268_s25  ;;  %s1844_s7 = sld [smem:[#allocation3 + %s1378_s30]] }
  0x43   : > { %s463_s30 = scvt.s32.f32 %s1844_s7 }
  0x44   : > { %1116 = vmatpush3.bf16.xpose.msra.mxu1 %v357_v5  ;;  %1096 = vmatpush3.bf16.xpose.msra.mxu0 %v357_v5 }
  0x45   : > { %1147 = vmatprep.subr.msk.bf16.mxu1 %vm334_vm1, %v1189_v6  ;;  %1097 = vmatprep.subr.bf16.mxu0 %v1328_v0 }
  0x4c   : > { %1118 = vmatpush3.bf16.xpose.msra.mxu1 %v354_v7  ;;  %1098 = vmatpush3.bf16.xpose.msra.mxu0 %v354_v7 }
  0x4d   : > { %1148 = vmatprep.subr.msk.bf16.mxu1 %vm334_vm1, %v1190_v8  ;;  %1099 = vmatprep.subr.bf16.mxu0 %v1328_v0 }
  0x54   : > { %1120 = vmatpush3.bf16.xpose.msra.mxu1 %v351_v9  ;;  %1100 = vmatpush3.bf16.xpose.msra.mxu0 %v351_v9  ;;  %v1560_v9 = vshrl.u32 %v406_v18, 7 }
  0x55   : > { %1149 = vmatprep.subr.msk.bf16.mxu1 %vm334_vm1, %v1191_v10  ;;  %1101 = vmatprep.subr.bf16.mxu0 %v1328_v0 }
  0x56   : > { %vm772_vm5 = vcmp.eq.s32.totalorder %v1560_v9, %v1459_v19 }
  0x5c   : > { %1122 = vmatpush3.bf16.xpose.msra.mxu1 %v348_v11  ;;  %1102 = vmatpush3.bf16.xpose.msra.mxu0 %v348_v11 }
  0x5d   : > { %1150 = vmatprep.subr.msk.bf16.mxu1 %vm334_vm1, %v1192_v12  ;;  %1103 = vmatprep.subr.bf16.mxu0 %v1328_v0 }
  0x64   : > { %1124 = vmatpush3.bf16.xpose.msra.mxu1 %v345_v13  ;;  %1104 = vmatpush3.bf16.xpose.msra.mxu0 %v345_v13  ;;  %v1574_v13 = vadd.s32 8, %v1560_v9 }
  0x65   : > { %1151 = vmatprep.subr.msk.bf16.mxu1 %vm334_vm1, %v1193_v14  ;;  %1105 = vmatprep.subr.bf16.mxu0 %v1328_v0 }
  0x66   : > { %vm773_vm3 = vcmp.eq.s32.totalorder %v1574_v13, %v1459_v19 }
  0x6c   : > { %1126 = vmatpush3.bf16.xpose.msra.mxu1 %v342_v15  ;;  %1106 = vmatpush3.bf16.xpose.msra.mxu0 %v342_v15 }
  0x6d   : > { %1152 = vmatprep.subr.msk.bf16.mxu1 %vm334_vm1, %v1194_v4  ;;  %1107 = vmatprep.subr.bf16.mxu0 %v1328_v0 }
  0x74   : > { %1128 = vmatpush3.bf16.xpose.msra.mxu1 %v339_v16  ;;  %1108 = vmatpush3.bf16.xpose.msra.mxu0 %v339_v16 }
  0x7b   : > { %1130 = vmatmul.mubr.msk.bf16.vlgmr.msra.gmra.mxu1 %vm334_vm1, %v1193_v14  ;;  %1110 = vmatmul.mubr.msk.bf16.vlgmr.msra.gmra.mxu0 %vm334_vm1, %v1195_v17  ;;  %v1590_v17 = vadd.s32 16, %v1560_v9 }
  0x7c   : > { %1133 = vmatprep.mubr.msk.bf16.mxu1 %vm334_vm1, %v1192_v12 }
  0x7d   : > { %vm774_vm4 = vcmp.eq.s32.totalorder %v1590_v17, %v1459_v19 }
  0x83   : > { %1134 = vmatmul.mubr.msk.bf16.gmra.mxu1 %vm334_vm1, %v1191_v10 }
  0x84   : > { %1137 = vmatprep.mubr.msk.bf16.mxu1 %vm334_vm1, %v1190_v8 }
  0x8b   : > { %1138 = vmatmul.mubr.msk.bf16.gmra.mxu1 %vm334_vm1, %v1189_v6 }
  0x8c   : > { %1141 = vmatprep.mubr.msk.bf16.mxu1 %vm334_vm1, %v1188_v2 }
  0x93   : > { %1142 = vmatmul.mubr.msk.bf16.gmra.mxu1 %vm334_vm1, %v1187_v1  ;;  %v403_v1 = vstv %s1520_s26 }
 0x13b   : > { %v1131_v22 = vpop.f32.mrf.mxu1  ;;  %v396_v24 = vpop.f32.mrf.mxu0 }
 0x13c   : > { %v568_v25 = vmul.f32 %v1131_v22, %v1464_v21  ;;  %v404_v7 = vmul.f32 %v403_v1, %v396_v24  ;;  %v1603_v22 = vadd.s32 24, %v1560_v9  ;;  %v1606_v24 = vadd.s32 56, %v1560_v9 }
 0x13d   : > { %v502_v26 = vpop.f32.mrf.mxu1  ;;  %v1111_v27 = vpop.f32.mrf.mxu0 }
 0x13e   : > { %v566_v28 = vmul.f32 %v1464_v21, %v502_v26  ;;  %v1476_v29 = vsel %vm1468_vm2, %v568_v25, -1e+30  ;;  %v1578_v14 = vsel %vm1468_vm2, %v404_v7, -1e+30  ;;  %vm775_vm6 = vcmp.eq.s32.totalorder %v1603_v22, %v1459_v19 }
 0x13f   : > { %616 = vmax.xlane.f32.xlu1 %v1476_v29  ;;  %v1132_v30 = vpop.f32.mrf.mxu1  ;;  %v1479_v31 = vpop.f32.mrf.mxu0  ;;  %v790_v25 = vsel %vm774_vm4, %v1476_v29, 0.0  ;;  %vm779_vm7 = vcmp.eq.s32.totalorder %v1606_v24, %v1459_v19  ;;  %v1615_v26 = vadd.s32 32, %v1560_v9  ;;  %v1618_v27 = vadd.s32 72, %v1560_v9 }
 0x140   : > { %v569_v32 = vmul.f32 %v1132_v30, %v1464_v21  ;;  %v1484_v33 = vsel %vm1468_vm2, %v566_v28, -1e+30  ;;  %v405_v15 = vmul.f32 %v403_v1, %v1479_v31  ;;  %v1627_v31 = vadd.s32 40, %v1560_v9 }
 0x141   : > { %612 = vmax.xlane.f32.xlu0 %v1484_v33  ;;  %v505_v34 = vpop.f32.mrf.mxu1  ;;  %v1112_v35 = vpop.f32.mrf.mxu0  ;;  %v788_v23 = vsel %vm772_vm5, %v1484_v33, 0.0  ;;  %vm776_vm8 = vcmp.eq.s32.totalorder %v1615_v26, %v1459_v19  ;;  %vm781_vm9 = vcmp.eq.s32.totalorder %v1618_v27, %v1459_v19  ;;  %vm853_vm4 = vcmp.lt.s32.totalorder %v1574_v13, %v1462_v20 }
 0x142   : > { %v567_v36 = vmul.f32 %v1464_v21, %v505_v34  ;;  %v1490_v37 = vsel %vm1468_vm2, %v569_v32, -1e+30  ;;  %vm777_vm10 = vcmp.eq.s32.totalorder %v1627_v31, %v1459_v19  ;;  %v1634_v35 = vadd.s32 48, %v1560_v9 }
 0x143   : > { %618 = vmax.xlane.f32.xlu1 %v1490_v37  ;;  %v1135_v38 = vpop.f32.mrf.mxu1  ;;  %v791_v28 = vsel %vm775_vm6, %v1490_v37, 0.0  ;;  %vm854_vm5 = vcmp.lt.s32.totalorder %v1590_v17, %v1462_v20  ;;  %vm855_vm6 = vcmp.lt.s32.totalorder %v1603_v22, %v1462_v20 }
 0x144   : > { %v1495_v39 = vsel %vm1468_vm2, %v567_v36, -1e+30  ;;  %v572_v43 = vmul.f32 %v1135_v38, %v1464_v21  ;;  %vm778_vm11 = vcmp.eq.s32.totalorder %v1634_v35, %v1459_v19  ;;  %v1640_v38 = vadd.s32 64, %v1560_v9 }
 0x145   : > { %614 = vmax.xlane.f32.xlu0 %v1495_v39  ;;  %v518_v40 = vpop.f32.mrf.mxu1  ;;  %v789_v18 = vsel %vm773_vm3, %v1495_v39, 0.0  ;;  %vm852_vm3 = vcmp.lt.s32.totalorder %v1560_v9, %v1462_v20 }
 0x146   : > { %v570_v41 = vmul.f32 %v1464_v21, %v518_v40  ;;  %v1509_v49 = vsel %vm1468_vm2, %v572_v43, -1e+30  ;;  %vm780_vm12 = vcmp.eq.s32.totalorder %v1640_v38, %v1459_v19 }
 0x147   : > { %v1136_v42 = vpop.f32.mrf.mxu1  ;;  %v794_v40 = vsel %vm778_vm11, %v1509_v49, 0.0  ;;  %vm858_vm11 = vcmp.lt.s32.totalorder %v1634_v35, %v1462_v20 }
 0x148   : > { %v1502_v44 = vsel %vm1468_vm2, %v570_v41, -1e+30  ;;  %v573_v48 = vmul.f32 %v1136_v42, %v1464_v21  ;;  %v1330_v42 = vmov 0  }
 0x149   : > { %620 = vmax.xlane.f32.xlu0 %v1502_v44  ;;  %v521_v45 = vpop.f32.mrf.mxu1  ;;  %v792_v32 = vsel %vm776_vm8, %v1502_v44, 0.0  ;;  %1186 = vset.pattern.permute.xlu1 %v1330_v42  ;;  %vm856_vm8 = vcmp.lt.s32.totalorder %v1615_v26, %v1462_v20 }
 0x14a   : > { %v571_v46 = vmul.f32 %v1464_v21, %v521_v45  ;;  %v1525_v55 = vsel %vm1468_vm2, %v573_v48, -1e+30  ;;  %1185 = vset.pattern.permute.xlu0 %v1330_v42 }
 0x14b   : > { %v1139_v47 = vpop.f32.mrf.mxu1  ;;  %v795_v30 = vsel %vm779_vm7, %v1525_v55, 0.0  ;;  %vm859_vm7 = vcmp.lt.s32.totalorder %v1606_v24, %v1462_v20 }
 0x14c   : > { %v1513_v50 = vsel %vm1468_vm2, %v571_v46, -1e+30  ;;  %v576_v54 = vmul.f32 %v1139_v47, %v1464_v21 }
 0x14d   : > { %624 = vmax.xlane.f32.xlu0 %v1509_v49  ;;  %622 = vmax.xlane.f32.xlu1 %v1513_v50  ;;  %v534_v51 = vpop.f32.mrf.mxu1  ;;  %v793_v36 = vsel %vm777_vm10, %v1513_v50, 0.0  ;;  %vm857_vm10 = vcmp.lt.s32.totalorder %v1627_v31, %v1462_v20 }
 0x14e   : > { %v574_v52 = vmul.f32 %v1464_v21, %v534_v51  ;;  %v1537_v61 = vsel %vm1468_vm2, %v576_v54, -1e+30 }
 0x14f   : > { %v1140_v53 = vpop.f32.mrf.mxu1 }
 0x150   : > { %v1529_v56 = vsel %vm1468_vm2, %v574_v52, -1e+30  ;;  %v577_v60 = vmul.f32 %v1140_v53, %v1464_v21 }
 0x151   : > { %626 = vmax.xlane.f32.xlu1 %v1525_v55  ;;  %628 = vmax.xlane.f32.xlu0 %v1529_v56  ;;  %v537_v57 = vpop.f32.mrf.mxu1  ;;  %v796_v41 = vsel %vm780_vm12, %v1529_v56, 0.0  ;;  %vm860_vm12 = vcmp.lt.s32.totalorder %v1640_v38, %v1462_v20 }
 0x152   : > { %v575_v58 = vmul.f32 %v1464_v21, %v537_v57  ;;  %v1550_v4 = vsel %vm1468_vm2, %v577_v60, -1e+30 }
 0x153   : > { %v1143_v59 = vpop.f32.mrf.mxu1 }
 0x154   : > { %v1541_v62 = vsel %vm1468_vm2, %v575_v58, -1e+30  ;;  %v580_v3 = vmul.f32 %v1143_v59, %v1464_v21 }
 0x155   : > { %632 = vmax.xlane.f32.xlu0 %v1537_v61  ;;  %630 = vmax.xlane.f32.xlu1 %v1541_v62  ;;  %v550_v63 = vpop.f32.mrf.mxu1  ;;  %v797_v34 = vsel %vm781_vm9, %v1541_v62, 0.0  ;;  %vm884_vm9 = vcmask 7168  }
 0x156   : > { %v578_v0 = vmul.f32 %v1464_v21, %v550_v63  ;;  %v1565_v11 = vsel %vm1468_vm2, %v580_v3, -1e+30 }
 0x157   : > { %v1144_v2 = vpop.f32.mrf.mxu1 }
 0x158   : > { %v1554_v5 = vsel %vm1468_vm2, %v578_v0, -1e+30  ;;  %v581_v10 = vmul.f32 %v1144_v2, %v1464_v21 }
 0x159   : > { %634 = vmax.xlane.f32.xlu1 %v1550_v4  ;;  %636 = vmax.xlane.f32.xlu0 %v1554_v5  ;;  %v553_v6 = vpop.f32.mrf.mxu1 }
 0x15a   : > { %v579_v8 = vmul.f32 %v1464_v21, %v553_v6  ;;  %v1583_v16 = vsel %vm1468_vm2, %v581_v10, -1e+30  ;;  %v1595_v21 = vsel %vm1468_vm2, %v405_v15, -1e+30 }
 0x15c   : > { %v1569_v12 = vsel %vm1468_vm2, %v579_v8, -1e+30 }
 0x15d   : > { %640 = vmax.xlane.f32.xlu0 %v1565_v11  ;;  %638 = vmax.xlane.f32.xlu1 %v1569_v12 }
 0x161   : > { %642 = vmax.xlane.f32.xlu1 %v1583_v16  ;;  %415 = vmax.xlane.f32.xlu0 %v1578_v14 }
 0x165   : > { %806 = vadd.xlane.f32.xlu0 %v789_v18  ;;  %417 = vmax.xlane.f32.xlu1 %v1595_v21 }
 0x169   : > { %808 = vadd.xlane.f32.xlu0 %v790_v25  ;;  %804 = vadd.xlane.f32.xlu1 %v788_v23 }
 0x16d   : > { %810 = vadd.xlane.f32.xlu0 %v791_v28  ;;  %818 = vadd.xlane.f32.xlu1 %v795_v30 }
 0x171   : > { %812 = vadd.xlane.f32.xlu0 %v792_v32  ;;  %822 = vadd.xlane.f32.xlu1 %v797_v34 }
 0x175   : > { %814 = vadd.xlane.f32.xlu0 %v793_v36 }
 0x179   : > { %816 = vadd.xlane.f32.xlu0 %v794_v40 }
 0x17d   : > { %820 = vadd.xlane.f32.xlu0 %v796_v41 }
 0x1c8   : > { %v1646_v43 = vpop.xlane.xlu1 %616 }
 0x1c9   : > { %v646_v45 = vsub.f32 %v1476_v29, %v1646_v43 }
 0x1ca   : > { %v1650_v46 = vpop.xlane.xlu0 %612 }
 0x1cb   : > { %v664_v47 = vmul.f32 1.442695, %v646_v45  ;;  %v644_v48 = vsub.f32 %v1484_v33, %v1650_v46 }
 0x1cc   : > { %v1656_v53 = vpop.xlane.xlu1 %618 }
 0x1cd   : > { %1196 = vpow2.f32 %v664_v47  ;;  %v660_v51 = vmul.f32 1.442695, %v644_v48  ;;  %v647_v15 = vsub.f32 %v1490_v37, %v1656_v53 }
 0x1ce   : > { %v1654_v52 = vpop.xlane.xlu0 %614 }
 0x1cf   : > { %1198 = vpow2.f32 %v660_v51  ;;  %v666_v30 = vmul.f32 1.442695, %v647_v15  ;;  %v645_v32 = vsub.f32 %v1495_v39, %v1654_v52 }
 0x1d1   : > { %v662_v37 = vmul.f32 1.442695, %v645_v32 }
 0x1d2   : > { %v1658_v54 = vpop.xlane.xlu0 %620 }
 0x1d3   : > { %v648_v36 = vsub.f32 %v1502_v44, %v1658_v54 }
 0x1d6   : > { %v1660_v57 = vpop.xlane.xlu0 %624  ;;  %v1662_v58 = vpop.xlane.xlu1 %622 }
 0x1d7   : > { %v650_v23 = vsub.f32 %v1509_v49, %v1660_v57  ;;  %v668_v49 = vmul.f32 1.442695, %v648_v36  ;;  %v649_v39 = vsub.f32 %v1513_v50, %v1662_v58  ;;  %v1714_v36 = vadd.s32 80, %v1560_v9 }
 0x1d9   : > { %v672_v40 = vmul.f32 1.442695, %v650_v23  ;;  %v670_v48 = vmul.f32 1.442695, %v649_v39  ;;  %v1709_v23 = vadd.s32 88, %v1560_v9  ;;  %vm782_vm14 = vcmp.eq.s32.totalorder %v1714_v36, %v1459_v19 }
 0x1da   : > { %v1197_v29 = vpop.eup %1196  ;;  %v1664_v59 = vpop.xlane.xlu1 %626  ;;  %v1732_v39 = vadd.s32 120, %v1560_v9 }
 0x1db   : > { %v1666_v60 = vpop.xlane.xlu0 %628  ;;  %696 = vadd.xlane.f32.xlu0 %v1197_v29  ;;  %v651_v41 = vsub.f32 %v1525_v55, %v1664_v59  ;;  %vm783_vm13 = vcmp.eq.s32.totalorder %v1709_v23, %v1459_v19 }
 0x1dc   : > { %v1199_v33 = vpop.eup %1198  ;;  %v652_v44 = vsub.f32 %v1529_v56, %v1666_v60  ;;  %1919 = vst [vmem:[#allocation9_spill] sm:$0xff] %v1732_v39  ;;  %vm787_vm1 = vcmp.eq.s32.totalorder %v1732_v39, %v1459_v19 }
 0x1dd   : > { %v674_v45 = vmul.f32 1.442695, %v651_v41 }
 0x1de   : > { %v1670_v0 = vpop.xlane.xlu1 %630  ;;  %v676_v55 = vmul.f32 1.442695, %v652_v44 }
 0x1df   : > { %v1668_v63 = vpop.xlane.xlu0 %632  ;;  %692 = vadd.xlane.f32.xlu0 %v1199_v33 }
 0x1e0   : > { %v654_v42 = vsub.f32 %v1537_v61, %v1668_v63 }
 0x1e2   : > { %v1672_v1 = vpop.xlane.xlu1 %634  ;;  %v680_v47 = vmul.f32 1.442695, %v654_v42  ;;  %v1727_v42 = vadd.s32 96, %v1560_v9 }
 0x1e3   : > { %v1674_v2 = vpop.xlane.xlu0 %636  ;;  %v655_v56 = vsub.f32 %v1550_v4, %v1672_v1 }
 0x1e4   : > { %vm784_vm0 = vcmp.eq.s32.totalorder %v1727_v42, %v1459_v19 }
 0x1e5   : > { %v682_v32 = vmul.f32 1.442695, %v655_v56 }
 0x1e6   : > { %v1678_v6 = vpop.xlane.xlu1 %638 }
 0x1e7   : > { %v1676_v3 = vpop.xlane.xlu0 %640 }
 0x1ea   : > { %v1680_v7 = vpop.xlane.xlu1 %642 }
 0x1eb   : > { %v1682_v8 = vpop.xlane.xlu0 %415 }
 0x1ec   : > { %v419_v10 = vsub.f32 %v1578_v14, %v1682_v8 }
 0x1ee   : > { %v421_v18 = vmul.f32 1.442695, %v419_v10  ;;  %v1688_v25 = vpop.xlane.xlu1 %417 }
 0x1ef   : > { %v420_v28 = vsub.f32 %v1595_v21, %v1688_v25 }
 0x1f0   : > { %1200 = vpow2.f32 %v421_v18 }
 0x1f1   : > { %v423_v34 = vmul.f32 1.442695, %v420_v28 }
 0x1f3   : > { %1202 = vpow2.f32 %v423_v34 }
 0x1f4   : > { %1204 = vpow2.f32 %v666_v30  ;;  %v653_v30 = vsub.f32 %v1541_v62, %v1670_v0  ;;  %v799_v62 = vsel %vm783_vm13, %v1550_v4, 0.0  ;;  %v798_v4 = vsel %vm782_vm14, %v1537_v61, 0.0 }
 0x1f5   : > { %1206 = vpow2.f32 %v672_v40  ;;  %v1719_v40 = vadd.s32 104, %v1560_v9  ;;  %v800_v61 = vsel %vm784_vm0, %v1554_v5, 0.0 }
 0x1f6   : > { %1208 = vpow2.f32 %v662_v37  ;;  %v678_v41 = vmul.f32 1.442695, %v653_v30  ;;  %v288_v30 = vld [vmem:[%s247_s0 + $0x8] sm:$0xff] }
 0x1f7   : > { %1210 = vpow2.f32 %v668_v49  ;;  %v658_v49 = vsub.f32 %v1565_v11, %v1676_v3  ;;  %vm785_vm15 = vcmp.eq.s32.totalorder %v1719_v40, %v1459_v19 }
 0x1f8   : > { %1212 = vpow2.f32 %v674_v45  ;;  %v656_v45 = vsub.f32 %v1554_v5, %v1674_v2 }
 0x1f9   : > { %1214 = vpow2.f32 %v680_v47  ;;  %v688_v44 = vmul.f32 1.442695, %v658_v49  ;;  %v801_v47 = vsel %vm785_vm15, %v1569_v12, 0.0  ;;  %vm861_vm15 = vcmp.lt.s32.totalorder %v1618_v27, %v1462_v20 }
 0x1fa   : > { %1216 = vpow2.f32 %v670_v48  ;;  %v1741_v48 = vadd.s32 112, %v1560_v9 }
 0x1fb   : > { %1218 = vpow2.f32 %v676_v55  ;;  %v659_v55 = vsub.f32 %v1583_v16, %v1680_v7 }
 0x1fc   : > { %1220 = vpow2.f32 %v682_v32  ;;  %1920 = vst [vmem:[#allocation10_spill] sm:$0xff] %v1741_v48  ;;  %vm786_vm2 = vcmp.eq.s32.totalorder %v1741_v48, %v1459_v19  ;;  %v1758_v32 = vpop.xlane.xlu0 %806 }
 0x1fd   : > { %v1201_v51 = vpop.eup %1200  ;;  %1222 = vpow2.f32 %v678_v41 }
 0x1fe   : > { %425 = vadd.xlane.f32.xlu1 %v1201_v51  ;;  %v684_v51 = vmul.f32 1.442695, %v656_v45  ;;  %1224 = vpow2.f32 %v688_v44  ;;  %v805_v45 = vpop.xlane.xlu1 %804 }
 0x200   : > { %v1203_v29 = vpop.eup %1202  ;;  %1226 = vpow2.f32 %v684_v51 }
 0x201   : > { %v1205_v33 = vpop.eup %1204  ;;  %427 = vadd.xlane.f32.xlu0 %v1203_v29  ;;  %v803_v29 = vsel %vm787_vm1, %v1583_v16, 0.0 }
 0x202   : > { %698 = vadd.xlane.f32.xlu1 %v1205_v33  ;;  %v1207_v10 = vpop.eup %1206  ;;  %v657_v33 = vsub.f32 %v1569_v12, %v1678_v6 }
 0x203   : > { %v1209_v50 = vpop.eup %1208 }
 0x204   : > { %v1211_v15 = vpop.eup %1210  ;;  %v686_v56 = vmul.f32 1.442695, %v657_v33 }
 0x205   : > { %704 = vadd.xlane.f32.xlu0 %v1207_v10  ;;  %v1213_v18 = vpop.eup %1212  ;;  %v690_v10 = vmul.f32 1.442695, %v659_v55 }
 0x206   : > { %694 = vadd.xlane.f32.xlu1 %v1209_v50  ;;  %v1215_v28 = vpop.eup %1214  ;;  %v802_v50 = vsel %vm786_vm2, %v1565_v11, 0.0  ;;  %v287_v11 = vld [vmem:[%s247_s0] sm:$0xff] }
 0x207   : > { %v1217_v34 = vpop.eup %1216  ;;  %1228 = vpow2.f32 %v690_v10 }
 0x208   : > { %v1219_v37 = vpop.eup %1218  ;;  %1230 = vpow2.f32 %v686_v56 }
 0x209   : > { %700 = vadd.xlane.f32.xlu0 %v1211_v15  ;;  %v1221_v15 = vpop.eup %1220 }
 0x20a   : > { %706 = vadd.xlane.f32.xlu1 %v1213_v18  ;;  %v1223_v5 = vpop.eup %1222 }
 0x20b   : > { %v1225_v16 = vpop.eup %1224 }
 0x20d   : > { %712 = vadd.xlane.f32.xlu0 %v1215_v28  ;;  %v1227_v18 = vpop.eup %1226 }
 0x20e   : > { %702 = vadd.xlane.f32.xlu1 %v1217_v34  ;;  %v1760_v34 = vpop.xlane.xlu0 %808 }
 0x211   : > { %708 = vadd.xlane.f32.xlu0 %v1219_v37 }
 0x212   : > { %826 = vadd.xlane.f32.xlu1 %v799_v62  ;;  %v1762_v37 = vpop.xlane.xlu0 %810 }
 0x214   : > { %v1229_v28 = vpop.eup %1228 }
 0x215   : > { %824 = vadd.xlane.f32.xlu0 %v798_v4  ;;  %v1231_v12 = vpop.eup %1230  ;;  %v1772_v4 = vpop.xlane.xlu1 %818 }
 0x216   : > { %830 = vadd.xlane.f32.xlu1 %v801_v47  ;;  %v1764_v41 = vpop.xlane.xlu0 %812 }
 0x219   : > { %828 = vadd.xlane.f32.xlu0 %v800_v61  ;;  %v1774_v51 = vpop.xlane.xlu1 %822 }
 0x21a   : > { %834 = vadd.xlane.f32.xlu1 %v803_v29  ;;  %v1766_v49 = vpop.xlane.xlu0 %814 }
 0x21d   : > { %832 = vadd.xlane.f32.xlu0 %v802_v50 }
 0x21e   : > { %714 = vadd.xlane.f32.xlu1 %v1221_v15  ;;  %v1768_v62 = vpop.xlane.xlu0 %816 }
 0x222   : > { %710 = vadd.xlane.f32.xlu1 %v1223_v5  ;;  %v1770_v44 = vpop.xlane.xlu0 %820 }
 0x226   : > { %720 = vadd.xlane.f32.xlu1 %v1225_v16 }
 0x22a   : > { %716 = vadd.xlane.f32.xlu1 %v1227_v18 }
 0x22e   : > { %722 = vadd.xlane.f32.xlu1 %v1229_v28 }
 0x232   : > { %718 = vadd.xlane.f32.xlu1 %v1231_v12 }
 0x233   : > { %438 = vperm.xlu0 %1185, %v287_v11  }
 0x243   : > { %441 = vperm.xlu1 %1186, %v288_v30  }
 0x264   : > { %v697_v47 = vpop.xlane.xlu0 %696 }
 0x268   : > { %v693_v55 = vpop.xlane.xlu0 %692 }
 0x269   : > { %1232 = vlog2.f32 %v693_v55 }
 0x26a   : > { %1234 = vlog2.f32 %v697_v47 }
 0x276   : > { %v1233_v56 = vpop.eup %1232 }
 0x277   : > { %v1235_v16 = vpop.eup %1234  ;;  %v725_v18 = vmul.f32 0.6931472, %v1233_v56 }
 0x278   : > { %v729_v12 = vmul.f32 0.6931472, %v1235_v16 }
 0x279   : > { %v756_v47 = vadd.f32 %v725_v18, %v1650_v46 }
 0x27a   : > { %v758_v39 = vadd.f32 %v729_v12, %v1646_v43 }
 0x27b   : > { %v836_v48 = vsub.f32 %v805_v45, %v756_v47 }
 0x27c   : > { %v838_v18 = vsub.f32 %v1760_v34, %v758_v39 }
 0x27e   : > { %v870_v34 = vsel %vm854_vm5, %v838_v18, 0.0  ;;  %vm863_vm5 = vcmp.lt.s32.totalorder %v1709_v23, %v1462_v20 }
 0x287   : > { %v426_v61 = vpop.xlane.xlu1 %425 }
 0x28a   : > { %v1776_v29 = vpop.xlane.xlu0 %427 }
 0x28b   : > { %v699_v33 = vpop.xlane.xlu1 %698 }
 0x28c   : > { %1236 = vlog2.f32 %v699_v33 }
 0x28e   : > { %v705_v10 = vpop.xlane.xlu0 %704 }
 0x28f   : > { %1238 = vlog2.f32 %v705_v10  ;;  %v695_v50 = vpop.xlane.xlu1 %694 }
 0x290   : > { %1240 = vlog2.f32 %v695_v50 }
 0x292   : > { %v701_v15 = vpop.xlane.xlu0 %700 }
 0x293   : > { %1242 = vlog2.f32 %v701_v15  ;;  %v707_v5 = vpop.xlane.xlu1 %706 }
 0x294   : > { %1244 = vlog2.f32 %v707_v5 }
 0x296   : > { %v713_v28 = vpop.xlane.xlu0 %712 }
 0x297   : > { %v703_v11 = vpop.xlane.xlu1 %702 }
 0x298   : > { %1246 = vlog2.f32 %v703_v11 }
 0x299   : > { %v1237_v30 = vpop.eup %1236 }
 0x29a   : > { %v731_v55 = vmul.f32 0.6931472, %v1237_v30  ;;  %v709_v33 = vpop.xlane.xlu0 %708 }
 0x29b   : > { %1248 = vlog2.f32 %v709_v33  ;;  %v1779_v10 = vpop.xlane.xlu1 %826 }
 0x29c   : > { %v1239_v50 = vpop.eup %1238  ;;  %v759_v5 = vadd.f32 %v731_v55, %v1656_v53  ;;  %v868_v53 = vsel %vm852_vm3, %v836_v48, 0.0  ;;  %1250 = vlog2.f32 %v426_v61 }
 0x29d   : > { %v1241_v15 = vpop.eup %1240  ;;  %v737_v16 = vmul.f32 0.6931472, %v1239_v50  ;;  %1252 = vlog2.f32 %v1776_v29 }
 0x29e   : > { %v727_v56 = vmul.f32 0.6931472, %v1241_v15  ;;  %v839_v45 = vsub.f32 %v1762_v37, %v759_v5  ;;  %1254 = vlog2.f32 %v713_v28 }
 0x29f   : > { %v1785_v11 = vpop.xlane.xlu1 %830 }
 0x2a0   : > { %v1243_v46 = vpop.eup %1242  ;;  %v757_v30 = vadd.f32 %v727_v56, %v1654_v52  ;;  %v762_v52 = vadd.f32 %v737_v16, %v1660_v57  ;;  %v871_v57 = vsel %vm855_vm6, %v839_v45, 0.0  ;;  %vm864_vm6 = vcmp.lt.s32.totalorder %v1727_v42, %v1462_v20  ;;  %v1921_v42 = vld [vmem:[#allocation10_spill] sm:$0xff] }
 0x2a1   : > { %v1245_v33 = vpop.eup %1244  ;;  %v733_v43 = vmul.f32 0.6931472, %v1243_v46  ;;  %v890_v29 = vsel %vm884_vm9, %v871_v57, 0.0 }
 0x2a2   : > { %v837_v12 = vsub.f32 %v1758_v32, %v757_v30  ;;  %v739_v47 = vmul.f32 0.6931472, %v1245_v33  ;;  %v885_v32 = vsel %vm884_vm9, %v868_v53, 0.0  ;;  %v842_v61 = vsub.f32 %v1768_v62, %v762_v52  ;;  %v1828_v30 = vpop.xlane.xlu0 %824 }
 0x2a3   : > { %v760_v17 = vadd.f32 %v733_v43, %v1658_v54  ;;  %v1803_v39 = vpop.xlane.xlu1 %834 }
 0x2a4   : > { %v869_v48 = vsel %vm853_vm4, %v837_v12, 0.0  ;;  %v763_v37 = vadd.f32 %v739_v47, %v1664_v59  ;;  %v888_v59 = vsel %vm884_vm9, %v870_v34, 0.0  ;;  %v874_v45 = vsel %vm858_vm11, %v842_v61, 0.0 }
 0x2a5   : > { %v1247_v55 = vpop.eup %1246  ;;  %v886_v50 = vsel %vm884_vm9, %v869_v48, 0.0  ;;  %v840_v15 = vsub.f32 %v1764_v41, %v760_v17  ;;  %vm862_vm4 = vcmp.lt.s32.totalorder %v1714_v36, %v1462_v20  ;;  %vm934_vm11 = vcmp.eq.s32.totalorder %v1459_v19, 1 }
 0x2a6   : > { %v887_v54 = vadd.f32 %v886_v50, %v885_v32  ;;  %v843_v5 = vsub.f32 %v1772_v4, %v763_v37  ;;  %v735_v56 = vmul.f32 0.6931472, %v1247_v55  ;;  %v1841_v47 = vpop.xlane.xlu0 %828 }
 0x2a7   : > { %v715_v16 = vpop.xlane.xlu1 %714  ;;  %v872_v22 = vsel %vm856_vm8, %v840_v15, 0.0  ;;  %vm866_vm8 = vcmp.lt.s32.totalorder %v1921_v42, %v1462_v20 }
 0x2a8   : > { %v1249_v46 = vpop.eup %1248  ;;  %v889_v41 = vadd.f32 %v888_v59, %v887_v54  ;;  %v875_v4 = vsel %vm859_vm7, %v843_v5, 0.0  ;;  %v761_v18 = vadd.f32 %v735_v56, %v1662_v58  ;;  %v892_v26 = vsel %vm884_vm9, %v872_v22, 0.0 }
 0x2a9   : > { %v741_v62 = vmul.f32 0.6931472, %v1249_v46  ;;  %v898_v31 = vsel %vm884_vm9, %v875_v4, 0.0  ;;  %v1251_v48 = vpop.eup %1250  ;;  %v445_v56 = vstv %s1844_s7  ;;  %vm865_vm7 = vcmp.lt.s32.totalorder %v1719_v40, %v1462_v20 }
 0x2aa   : > { %v891_v33 = vadd.f32 %v890_v29, %v889_v41  ;;  %v841_v43 = vsub.f32 %v1766_v49, %v761_v18  ;;  %v1253_v55 = vpop.eup %1252  ;;  %v1848_v50 = vpop.xlane.xlu0 %832  ;;  %v430_v57 = vmul.f32 0.6931472, %v1251_v48  ;;  %vm446_vm13 = vcmp.lt.s32.totalorder %v1560_v9, %v445_v56 }
 0x2ab   : > { %v764_v53 = vadd.f32 %v741_v62, %v1666_v60  ;;  %v711_v24 = vpop.xlane.xlu1 %710  ;;  %v896_v60 = vsel %vm884_vm9, %v874_v45, 0.0  ;;  %v1255_v15 = vpop.eup %1254  ;;  %v432_v5 = vmul.f32 0.6931472, %v1253_v55  ;;  %vm447_vm0 = vcmp.lt.s32.totalorder %v1574_v13, %v445_v56 }
 0x2ac   : > { %v893_v58 = vadd.f32 %v892_v26, %v891_v33  ;;  %v873_v35 = vsel %vm857_vm10, %v841_v43, 0.0  ;;  %1256 = vlog2.f32 %v711_v24  ;;  %v745_v61 = vmul.f32 0.6931472, %v1255_v15 }
 0x2ad   : > { %v894_v28 = vsel %vm884_vm9, %v873_v35, 0.0  ;;  %v844_v49 = vsub.f32 %v1770_v44, %v764_v53  ;;  %1258 = vlog2.f32 %v715_v16  ;;  %v433_v22 = vadd.f32 %v430_v57, %v1682_v8 }
 0x2ae   : > { %v895_v12 = vadd.f32 %v894_v28, %v893_v58  ;;  %v439_v16 = vpop.permute.xlu0 %438  ;;  %v434_v18 = vadd.f32 %v432_v5, %v1688_v25  ;;  %v766_v62 = vadd.f32 %v745_v61, %v1668_v63 }
 0x2af   : > { %v721_v52 = vpop.xlane.xlu1 %720  ;;  %v876_v34 = vsel %vm860_vm12, %v844_v49, 0.0  ;;  %vm443_vm14 = vcmp.eq.s32.totalorder %v1459_v19, %v439_v16  ;;  %vm932_vm12 = vcmp.eq.s32.totalorder %v1459_v19, 0 }
 0x2b0   : > { %v897_v17 = vadd.f32 %v896_v60, %v895_v12  ;;  %v900_v37 = vsel %vm884_vm9, %v876_v34, 0.0  ;;  %1260 = vlog2.f32 %v721_v52  ;;  %vm448_vm1 = vmand %vm443_vm14, %vm446_vm13  ;;  %v436_v25 = vsub.f32 %v1595_v21, %v434_v18 }
 0x2b1   : > { %v846_v27 = vsub.f32 %v1828_v30, %v766_v62  ;;  %v927_v18 = vstv %s926_s8 }
 0x2b2   : > { %v899_v38 = vadd.f32 %v898_v31, %v897_v17 }
 0x2b3   : > { %v717_v44 = vpop.xlane.xlu1 %716 }
 0x2b4   : > { %v901_v32 = vadd.f32 %v900_v37, %v899_v38  ;;  %1262 = vlog2.f32 %v717_v44 }
 0x2b7   : > { %v723_v54 = vpop.xlane.xlu1 %722 }
 0x2b8   : > { %1264 = vlog2.f32 %v723_v54 }
 0x2b9   : > { %v1257_v59 = vpop.eup %1256 }
 0x2ba   : > { %v1259_v46 = vpop.eup %1258  ;;  %v743_v41 = vmul.f32 0.6931472, %v1257_v59 }
 0x2bb   : > { %v719_v4 = vpop.xlane.xlu1 %718  ;;  %v747_v33 = vmul.f32 0.6931472, %v1259_v46 }
 0x2bc   : > { %v765_v29 = vadd.f32 %v743_v41, %v1670_v0  ;;  %1266 = vlog2.f32 %v719_v4  ;;  %v435_v0 = vsub.f32 %v1578_v14, %v433_v22 }
 0x2bd   : > { %v1261_v26 = vpop.eup %1260  ;;  %v767_v63 = vadd.f32 %v747_v33, %v1672_v1  ;;  %v878_v1 = vsel %vm862_vm4, %v846_v27, 0.0 }
 0x2be   : > { %v845_v43 = vsub.f32 %v1774_v51, %v765_v29  ;;  %v450_v58 = vsel %vm448_vm1, %v435_v0, 0.0  ;;  %v753_v49 = vmul.f32 0.6931472, %v1261_v26  ;;  %v904_v17 = vsel %vm884_vm9, %v878_v1, 0.0 }
 0x2bf   : > { %v442_v8 = vpop.permute.xlu1 %441  ;;  %v847_v12 = vsub.f32 %v1779_v10, %v767_v63 }
 0x2c0   : > { %v877_v53 = vsel %vm861_vm15, %v845_v43, 0.0  ;;  %vm444_vm2 = vcmp.eq.s32.totalorder %v1459_v19, %v442_v8  ;;  %v770_v36 = vadd.f32 %v753_v49, %v1676_v3 }
 0x2c1   : > { %v1263_v24 = vpop.eup %1262  ;;  %v902_v45 = vsel %vm884_vm9, %v877_v53, 0.0  ;;  %vm449_vm3 = vmand %vm444_vm2, %vm447_vm0 }
 0x2c2   : > { %v903_v51 = vadd.f32 %v902_v45, %v901_v32  ;;  %v749_v13 = vmul.f32 0.6931472, %v1263_v24  ;;  %v451_v35 = vsel %vm449_vm3, %v436_v25, 0.0  ;;  %v850_v38 = vsub.f32 %v1848_v50, %v770_v36 }
 0x2c3   : > { %v452_v28 = vadd.f32 %v451_v35, %v450_v58 }
 0x2c4   : > { %v768_v14 = vadd.f32 %v749_v13, %v1674_v2  ;;  %v879_v2 = vsel %vm863_vm5, %v847_v12, 0.0  ;;  %v905_v48 = vadd.f32 %v904_v17, %v903_v51  ;;  %v882_v32 = vsel %vm866_vm8, %v850_v38, 0.0 }
 0x2c5   : > { %v1265_v21 = vpop.eup %1264  ;;  %453 = vadd.xlane.f32.xlu1 %v452_v28  ;;  %v906_v3 = vsel %vm884_vm9, %v879_v2, 0.0  ;;  %v912_v54 = vsel %vm884_vm9, %v882_v32, 0.0 }
 0x2c6   : > { %v848_v30 = vsub.f32 %v1841_v47, %v768_v14  ;;  %v755_v60 = vmul.f32 0.6931472, %v1265_v21  ;;  %v907_v44 = vadd.f32 %v906_v3, %v905_v48 }
 0x2c8   : > { %v771_v34 = vadd.f32 %v755_v60, %v1680_v7  ;;  %v880_v31 = vsel %vm864_vm6, %v848_v30, 0.0 }
 0x2c9   : > { %v1267_v52 = vpop.eup %1266  ;;  %v908_v47 = vsel %vm884_vm9, %v880_v31, 0.0 }
 0x2ca   : > { %v751_v10 = vmul.f32 0.6931472, %v1267_v52  ;;  %v851_v37 = vsub.f32 %v1803_v39, %v771_v34  ;;  %v909_v50 = vadd.f32 %v908_v47, %v907_v44  ;;  %v464_v39 = vstv %s463_s30 }
 0x2cb   : > { %1268 = vrcp.f32 %v464_v39 }
 0x2cc   : > { %v769_v23 = vadd.f32 %v751_v10, %v1678_v6  ;;  %v1922_v6 = vld [vmem:[#allocation9_spill] sm:$0xff]  ;;  %1270 = vrcp.f32 %v927_v18 }
 0x2cd   : > { %vm867_vm10 = vcmp.lt.s32.totalorder %v1922_v6, %v1462_v20 }
 0x2ce   : > { %v849_v7 = vsub.f32 %v1785_v11, %v769_v23  ;;  %v883_v15 = vsel %vm867_vm10, %v851_v37, 0.0 }
 0x2cf   : > { %v914_v56 = vsel %vm884_vm9, %v883_v15, 0.0 }
 0x2d0   : > { %v881_v55 = vsel %vm865_vm7, %v849_v7, 0.0 }
 0x2d1   : > { %v910_v40 = vsel %vm884_vm9, %v881_v55, 0.0  ;;  %vm931_vm9 = vcmp.eq.s32.totalorder %v1560_v9, 0 }
 0x2d2   : > { %v911_v57 = vadd.f32 %v910_v40, %v909_v50  ;;  %vm935_vm13 = vmand %vm931_vm9, %vm934_vm11 }
 0x2d3   : > { %vm933_vm14 = vmand %vm931_vm9, %vm932_vm12 }
 0x2d4   : > { %v913_v5 = vadd.f32 %v912_v54, %v911_v57 }
 0x2d6   : > { %v915_v11 = vadd.f32 %v914_v56, %v913_v5 }
 0x2d8   : > { %916 = vadd.xlane.f32.xlu0 %v915_v11  ;;  %v1269_v22 = vpop.eup %1268 }
 0x2d9   : > { %v1271_v53 = vpop.eup %1270 }
 0x34e   : > { %v454_v59 = vpop.xlane.xlu1 %453 }
 0x34f   : > { %v455_v20 = vrot.slane %v454_v59, 4 }
 0x351   : > { %v456_v61 = vadd.f32 %v455_v20, %v454_v59 }
 0x353   : > { %v457_v16 = vrot.slane %v456_v61, 2 }
 0x355   : > { %v458_v46 = vadd.f32 %v457_v16, %v456_v61 }
 0x357   : > { %v459_v41 = vrot.slane %v458_v46, 1 }
 0x359   : > { %v460_v4 = vadd.f32 %v459_v41, %v458_v46 }
 0x35b   : > { %1153 = vpush %v460_v4 }
 0x35c   : > { %1155 = vpush %v1269_v22 }
 0x361   : > { %v917_v29 = vpop.xlane.xlu0 %916 }
 0x362   : > { %v918_v62 = vrot.slane %v917_v29, 4 }
 0x364   : > { %v919_v33 = vadd.f32 %v918_v62, %v917_v29 }
 0x366   : > { %v920_v43 = vrot.slane %v919_v33, 2 }
 0x368   : > { %v921_v8 = vadd.f32 %v920_v43, %v919_v33 }
 0x36a   : > { %v922_v26 = vrot.slane %v921_v8, 1 }
 0x36c   : > { %v923_v0 = vadd.f32 %v922_v26, %v921_v8 }
 0x36e   : > { %1157 = vpush %v923_v0 }
 0x36f   : > { %1159 = vpush %v1271_v53 }
 0x38c   : > { %s1154_s9 = spop %1153 }
 0x38d   : > { %s462_s10 = ssub.f32 0.0, %s1154_s9  ;;  %s1156_s11 = spop %1155 }
 0x38f   : > { %s467_s16 = smul.f32 %s1156_s11, %s462_s10 }
 0x391   : > { %v938_v24 = vstv %s467_s16 }
 0x39f   : > { %s1158_s12 = spop %1157 }
 0x3a0   : > { %s925_s14 = ssub.f32 0.0, %s1158_s12  ;;  %s1160_s15 = spop %1159 }
 0x3a2   : > { %s930_s17 = smul.f32 %s1160_s15, %s925_s14 }
 0x3a4   : > { %v936_v25 = vstv %s930_s17 }
 0x3a5   : > { %v937_v27 = vsel %vm935_vm13, %v936_v25, 0.0 }
 0x3a6   : > { %v939_v63 = vsel %vm933_vm14, %v938_v24, %v937_v27 }
 0x3a7   : > { %940 = vst [vmem:[%s261_s21] sm:$0xff] %v939_v63 }
 0x3a8 PF: > { %s27_s1 = sadd.s32 1, %s1323_s1  }
 0x3a9   : > { %p24_p11 = scmp.ge.s32.totalorder %s27_s1, 4  }
 0x3ab   :  { %26 = sbr.rel (!%p24_p11) target bundleno = 26 (0x1a), region = 77 }
 0x3b0   :  { %960 = vsyncpa [#allocation6], 1 }
 0x3b1   :  { %962 = vsyncpa [#allocation6 + $0x1], 1 }

</bundles_post_ra>
